<compile_context>
chip_gen: v7x
topology: tpu7x:2x2x1
jax: 0.10.0
libtpu: 0.0.40
codegen_flags: <defaults>
</compile_context>

<pallas_src>
import functools
import itertools

import numpy as np
import jax
import jax.numpy as jnp
from jax import lax
from jax.experimental import pallas as pl
from jax.experimental.pallas import tpu as pltpu

_BN_EPS = 1e-5
_LANE = 128
_VMEM_LIMIT = 32 * 1024 * 1024  # <= 48 MiB so the budget also holds on v7x


def _round_up(x, m):
    return ((x + m - 1) // m) * m


def _grid_params():
    return pltpu.CompilerParams(dimension_semantics=("parallel",),
                                vmem_limit_bytes=_VMEM_LIMIT)


# --------------------------------------------------------------------------
# Kernels
# --------------------------------------------------------------------------
def _mm_stats_kernel(x_ref, w_ref, y_ref, st_ref):
    """y = x @ w (bf16 in, f32 acc, bf16 out) + per-tile channel sum/sumsq.

    Specialized for inputs whose padded rows are already exactly zero, so no
    input affine and no row mask are needed (zero rows contribute nothing to
    the BN statistics)."""
    y = jnp.dot(x_ref[...], w_ref[...], preferred_element_type=jnp.float32)
    y_ref[...] = y.astype(y_ref.dtype)
    s = jnp.sum(y, axis=0, keepdims=True)
    sq = jnp.sum(y * y, axis=0, keepdims=True)
    st_ref[...] = jnp.concatenate(
        [s, sq, jnp.zeros((6, y.shape[1]), jnp.float32)], axis=0)


def _mm_affine_stats_kernel(x_ref, w_ref, a_ref, b_ref, y_ref, st_ref, *,
                            n_real, tile_n):
    """y = ((x*a + b) * row_mask) @ w  + per-tile channel sum/sumsq.
    Used for conv3, where the BN2 affine is fused into the matmul input."""
    i = pl.program_id(0)
    row = i * tile_n + lax.broadcasted_iota(jnp.int32, (tile_n, 1), 0)
    mask = (row < n_real).astype(jnp.float32)
    xin = (x_ref[...].astype(jnp.float32) * a_ref[...] + b_ref[...]) * mask
    y = jnp.dot(xin.astype(w_ref.dtype), w_ref[...],
                preferred_element_type=jnp.float32)
    y_ref[...] = y.astype(y_ref.dtype)
    s = jnp.sum(y, axis=0, keepdims=True)
    sq = jnp.sum(y * y, axis=0, keepdims=True)
    st_ref[...] = jnp.concatenate(
        [s, sq, jnp.zeros((6, y.shape[1]), jnp.float32)], axis=0)


def _bn1_apply_kernel(y_ref, a_ref, b_ref, z_ref, *, n_real, tile_n, col0, c1):
    """z1 = (h1*a1 + b1) * row_mask, stored compact (tile_n, C1) bf16.
    h1 lives in columns [col0, col0+c1) of the fused conv1/downsample output.
    Padded rows are forced to zero so the absent-neighbour gather row stays 0."""
    i = pl.program_id(0)
    row = i * tile_n + lax.broadcasted_iota(jnp.int32, (tile_n, 1), 0)
    mask = (row < n_real).astype(jnp.float32)
    h1 = y_ref[:, col0:col0 + c1].astype(jnp.float32)   # static lane window
    z_ref[...] = ((h1 * a_ref[...] + b_ref[...]) * mask).astype(z_ref.dtype)


def _epilogue_kernel(h_ref, r_ref, ah_ref, bh_ref, ar_ref, br_ref, o_ref, *,
                     n_real, tile_n, c_out_p):
    """out = relu(bn3(h3) + bn_d(res)) * row_mask.

    The downsample BN is a width-c_res affine applied to the raw residual
    input (either the fused conv1/dn output, whose residual columns are
    [0, c4), or x itself in the identity case); columns beyond c4 carry
    a = b = 0, so only a prefix crop / zero-pad is needed to align widths."""
    i = pl.program_id(0)
    row = i * tile_n + lax.broadcasted_iota(jnp.int32, (tile_n, 1), 0)
    mask = (row < n_real).astype(jnp.float32)
    main = h_ref[...].astype(jnp.float32) * ah_ref[...] + bh_ref[...]
    rt = r_ref[...].astype(jnp.float32) * ar_ref[...] + br_ref[...]
    cr = rt.shape[1]
    if cr > c_out_p:
        rt = rt[:, :c_out_p]
    elif cr < c_out_p:
        rt = jnp.concatenate(
            [rt, jnp.zeros((tile_n, c_out_p - cr), jnp.float32)], axis=-1)
    o_ref[...] = (jnp.maximum(main + rt, 0.0) * mask).astype(o_ref.dtype)


# --------------------------------------------------------------------------
# pallas_call wrappers (all tiled over voxels, "parallel" tile axis)
# --------------------------------------------------------------------------
def _conv_stats(x, w, tile_n, affine=None, n_real=None):
    """Tiled matmul with fused BN-stat partials; optional fused input affine
    + row mask (used when the input is not guaranteed zero on padded rows)."""
    npad, cin = x.shape
    cw = w.shape[1]
    ntiles = npad // tile_n
    if affine is None:
        kern = _mm_stats_kernel
        extra_in, extra_specs = (), ()
    else:
        a, b = affine
        kern = functools.partial(_mm_affine_stats_kernel,
                                 n_real=n_real, tile_n=tile_n)
        extra_in = (a, b)
        extra_specs = (pl.BlockSpec((1, cin), lambda i: (0, 0)),
                       pl.BlockSpec((1, cin), lambda i: (0, 0)))
    y, st = pl.pallas_call(
        kern,
        out_shape=(jax.ShapeDtypeStruct((npad, cw), jnp.bfloat16),
                   jax.ShapeDtypeStruct((ntiles * 8, cw), jnp.float32)),
        grid_spec=pltpu.PrefetchScalarGridSpec(
            num_scalar_prefetch=0,
            grid=(ntiles,),
            in_specs=[pl.BlockSpec((tile_n, cin), lambda i: (i, 0)),
                      pl.BlockSpec((cin, cw), lambda i: (0, 0)),  # resident W
                      *extra_specs],
            out_specs=[pl.BlockSpec((tile_n, cw), lambda i: (i, 0)),
                       pl.BlockSpec((8, cw), lambda i: (i, 0))],
        ),
        compiler_params=_grid_params(),
    )(x, w, *extra_in)
    st = st.reshape(ntiles, 8, cw)
    return y, jnp.sum(st[:, 0, :], axis=0), jnp.sum(st[:, 1, :], axis=0)


def _bn1_apply(y, a1, b1, col0, c1, n_real, tile_n):
    npad = y.shape[0]
    ntiles = npad // tile_n
    kern = functools.partial(_bn1_apply_kernel, n_real=n_real, tile_n=tile_n,
                             col0=col0, c1=c1)
    return pl.pallas_call(
        kern,
        out_shape=jax.ShapeDtypeStruct((npad, c1), jnp.bfloat16),
        grid_spec=pltpu.PrefetchScalarGridSpec(
            num_scalar_prefetch=0,
            grid=(ntiles,),
            in_specs=[pl.BlockSpec((tile_n, y.shape[1]), lambda i: (i, 0)),
                      pl.BlockSpec((1, c1), lambda i: (0, 0)),
                      pl.BlockSpec((1, c1), lambda i: (0, 0))],
            out_specs=pl.BlockSpec((tile_n, c1), lambda i: (i, 0)),
        ),
        compiler_params=_grid_params(),
    )(y, a1, b1)


def _epilogue(h3, res, a3, b3, ar, br, c4p, n_real, tile_n):
    npad = h3.shape[0]
    ntiles = npad // tile_n
    kern = functools.partial(_epilogue_kernel, n_real=n_real, tile_n=tile_n,
                             c_out_p=c4p)
    return pl.pallas_call(
        kern,
        out_shape=jax.ShapeDtypeStruct((npad, c4p), jnp.float32),
        grid_spec=pltpu.PrefetchScalarGridSpec(
            num_scalar_prefetch=0,
            grid=(ntiles,),
            in_specs=[pl.BlockSpec((tile_n, h3.shape[1]), lambda i: (i, 0)),
                      pl.BlockSpec((tile_n, res.shape[1]), lambda i: (i, 0)),
                      pl.BlockSpec((1, a3.shape[1]), lambda i: (0, 0)),
                      pl.BlockSpec((1, b3.shape[1]), lambda i: (0, 0)),
                      pl.BlockSpec((1, ar.shape[1]), lambda i: (0, 0)),
                      pl.BlockSpec((1, br.shape[1]), lambda i: (0, 0))],
            out_specs=pl.BlockSpec((tile_n, c4p), lambda i: (i, 0)),
        ),
        compiler_params=_grid_params(),
    )(h3, res, a3, b3, ar, br)


def _bn_affine(ssum, ssq, n_real, gamma, beta):
    """Training-mode BatchNorm folded to a per-channel affine y = x*a + b."""
    mean = ssum / n_real
    var = jnp.maximum(ssq / n_real - mean * mean, 0.0)  # biased variance
    inv = lax.rsqrt(var + _BN_EPS)
    a = gamma * inv
    b = beta - mean * a
    return (a.reshape(1, -1).astype(jnp.float32),
            b.reshape(1, -1).astype(jnp.float32))


# --------------------------------------------------------------------------
# Bottleneck forward
# --------------------------------------------------------------------------
def bottleneck_forward(feats, nbr_idx, params, n_real, *, tile_n=512,
                       tile_elem=1024):
    """feats: (Npad, Cin), rows >= n_real MUST be exactly zero.
    nbr_idx: (Npad, K) int32 neighbour row index per kernel offset (absent
    neighbours / padded rows point at a zero-padded row >= n_real).
    n_real: python int.  Returns (Npad, round_up(4*C1,128)) float32."""
    npad, cin = feats.shape
    assert npad > n_real
    assert npad % tile_n == 0 and npad % tile_elem == 0
    k_vol = nbr_idx.shape[1]
    c1 = params["w1"].shape[1]
    c4 = params["w3"].shape[1]
    c1p = _round_up(c1, _LANE)
    c4p = _round_up(c4, _LANE)
    f32, bf16 = jnp.float32, jnp.bfloat16

    def padw(w, rows, cols):
        return jnp.zeros((rows, cols), f32).at[:w.shape[0], :w.shape[1]].set(w)

    def padv(v, cols):
        return jnp.zeros((cols,), f32).at[:v.shape[0]].set(v)

    x_bf = feats.astype(bf16)
    has_dn = params.get("wd", None) is not None

    # ---- conv1 (+ downsample 1x1) : ONE fused matmul over x, x read once ---
    if has_dn:
        wcat = jnp.concatenate([params["wd"], params["w1"]], axis=1)  # [wd|w1]
        col0 = c4                               # h1 columns start after dn cols
    else:
        wcat = params["w1"]
        col0 = 0
    ccat_p = _round_up(wcat.shape[1], _LANE)
    wcat_p = padw(wcat, cin, ccat_p).astype(bf16)
    y, s, q = _conv_stats(x_bf, wcat_p, tile_n)          # y: (Npad, ccat_p) bf16
    a1, b1 = _bn_affine(s[col0:col0 + c1], q[col0:col0 + c1], n_real,
                        params["g1"], params["b1"])

    # ---- BN1 apply -> compact bf16 gather source ---------------------------
    z1 = _bn1_apply(y, a1, b1, col0, c1, n_real, tile_elem)  # (Npad, C1) bf16

    # ---- conv2: ks^3 sparse conv folded into one K*C1-deep contraction -----
    # TODO(synk): do this gather inside the conv2 kernel (VMEM-resident z1
    #             row-gather or scalar-prefetch-driven DMA gather) to avoid
    #             materializing (Npad, K*C1) in HBM; contraction kept at K*C1
    #             (not padded to 512) since the extra zero columns would cost
    #             more HBM bytes than the MXU remainder pass they save.
    g = jnp.take(z1, nbr_idx, axis=0).reshape(npad, k_vol * c1)      # bf16
    w2p = padw(params["w2"].reshape(k_vol * c1, c1),
               k_vol * c1, c1p).astype(bf16)
    h2, s2, q2 = _conv_stats(g, w2p, tile_n)             # h2: (Npad, c1p) bf16
    a2, b2 = _bn_affine(s2, q2, n_real,
                        padv(params["g2"], c1p), padv(params["b2"], c1p))

    # ---- conv3 (1x1) with BN2-apply fused into its input affine ------------
    w3p = padw(params["w3"], c1p, c4p).astype(bf16)
    h3, s3, q3 = _conv_stats(h2, w3p, tile_n, affine=(a2, b2), n_real=n_real)
    a3, b3 = _bn_affine(s3, q3, n_real,
                        padv(params["g3"], c4p), padv(params["b3"], c4p))

    # ---- residual affine + fused BN3 + add + ReLU epilogue -----------------
    if has_dn:
        ad, bd = _bn_affine(s[:c4], q[:c4], n_real, params["gd"], params["bd"])
        ar = jnp.zeros((1, ccat_p), f32).at[:, :c4].set(ad)
        br = jnp.zeros((1, ccat_p), f32).at[:, :c4].set(bd)
        res = y                     # residual already lives in columns [0, c4)
    else:
        # Identity residual: pass x directly, pad to c4p inside the kernel.
        ar = jnp.ones((1, cin), f32)
        br = jnp.zeros((1, cin), f32)
        res = x_bf

    return _epilogue(h3, res, a3, b3, ar, br, c4p, n_real, tile_elem)


# --------------------------------------------------------------------------
# Host-side glue: sparse-conv kernel map (neighbour index table)
# --------------------------------------------------------------------------
def build_neighbor_table(coords, grid_size, npad, n_real, ks=3, dilation=1):
    """(Npad, K) int32 neighbour row index per kernel offset; absent neighbours
    and padded rows point at row n_real (guaranteed zero).  stride == 1 only."""
    # TODO(synk): stride > 1 output-coordinate downsampling not implemented.
    assert npad > n_real
    B = int(coords[:, 0].max()) + 1
    vol = np.full((B,) + (grid_size,) * 3, n_real, dtype=np.int64)
    vol[coords[:, 0], coords[:, 1], coords[:, 2], coords[:, 3]] = np.arange(n_real)
    r = ks // 2
    offs = list(itertools.product(range(-r, r + 1), repeat=3))
    nbr = np.full((npad, len(offs)), n_real, dtype=np.int32)
    for k, off in enumerate(offs):
        nb = coords[:, 1:4] + dilation * np.array(off)
        inb = np.all((nb >= 0) & (nb < grid_size), axis=1)
        nbc = np.clip(nb, 0, grid_size - 1)
        idx = vol[coords[:, 0], nbc[:, 0], nbc[:, 1], nbc[:, 2]]
        nbr[:n_real, k] = np.where(inb, idx, n_real)
    return nbr


# --------------------------------------------------------------------------
# Pure-JAX reference (module semantics, float32)
# --------------------------------------------------------------------------
def reference_bottleneck(feats, nbr_idx, params, n_real):
    f = feats[:n_real].astype(jnp.float32)

    def bn(h, g, b):
        mean = h.mean(axis=0, keepdims=True)
        var = ((h - mean) ** 2).mean(axis=0, keepdims=True)
        return (h - mean) * lax.rsqrt(var + _BN_EPS) * g + b

    h1 = f @ params["w1"]
    z1 = bn(h1, params["g1"], params["b1"])
    z1z = jnp.concatenate([z1, jnp.zeros((1, z1.shape[1]), z1.dtype)], axis=0)
    gat = z1z[nbr_idx[:n_real]]                                # (N, K, C1)
    h2 = jnp.einsum("nkc,kcd->nd", gat, params["w2"])
    z2 = bn(h2, params["g2"], params["b2"])
    h3 = z2 @ params["w3"]
    z3 = bn(h3, params["g3"], params["b3"])
    if params.get("wd", None) is None:
        res = f
    else:
        res = bn(f @ params["wd"], params["gd"], params["bd"])
    return jnp.maximum(z3 + res, 0.0)


# --------------------------------------------------------------------------
if __name__ == "__main__":
    inc, outc, ks, stride, dilation = 16, 16, 3, 1, 1
    C1, C4, K = outc, outc * 4, ks ** 3
    B, G = 2, 6
    TILE_N, TILE_E = 512, 1024     # matmul / elementwise voxel tiles

    key = jax.random.PRNGKey(0)
    kf, k1, k2, k3, kd = jax.random.split(key, 5)

    # deterministic sparse occupancy: voxels with (x+y+z) even -> 108 per batch
    xs, ys, zs = np.meshgrid(np.arange(G), np.arange(G), np.arange(G), indexing="ij")
    vox = np.argwhere((xs + ys + zs) % 2 == 0)
    coords = np.concatenate(
        [np.concatenate([np.full((len(vox), 1), b), vox], axis=1) for b in range(B)],
        axis=0).astype(np.int64)                               # (216, 4)
    N = coords.shape[0]
    Npad = _round_up(N + 1, max(TILE_N, TILE_E))               # zero row exists

    feats = jax.random.normal(kf, (N, inc), dtype=jnp.float32)
    feats_pad = jnp.zeros((Npad, inc), jnp.float32).at[:N].set(feats)

    def winit(k, shape, fan_in):
        return jax.random.normal(k, shape, dtype=jnp.float32) * (2.0 / fan_in) ** 0.5

    params = dict(
        w1=winit(k1, (inc, C1), inc),
        w2=winit(k2, (K, C1, C1), C1 * K),
        w3=winit(k3, (C1, C4), C1),
        g1=jnp.ones((C1,), jnp.float32), b1=jnp.zeros((C1,), jnp.float32),
        g2=jnp.ones((C1,), jnp.float32), b2=jnp.zeros((C1,), jnp.float32),
        g3=jnp.ones((C4,), jnp.float32), b3=jnp.zeros((C4,), jnp.float32),
    )
    if inc == C4 and stride == 1:
        params["wd"] = None
    else:
        params["wd"] = winit(kd, (inc, C4), inc)
        params["gd"] = jnp.ones((C4,), jnp.float32)
        params["bd"] = jnp.zeros((C4,), jnp.float32)

    nbr_idx = jnp.asarray(
        build_neighbor_table(coords, G, Npad, N, ks=ks, dilation=dilation), jnp.int32)

    out = bottleneck_forward(feats_pad, nbr_idx, params, N,
                             tile_n=TILE_N, tile_elem=TILE_E)
    out = jax.block_until_ready(out)

    ref = reference_bottleneck(feats_pad, nbr_idx, params, N)
    # bf16 weights + bf16 intermediates (f32 MXU accumulation, f32 BN stats)
    # -> relaxed tolerance vs the f32 reference.
    np.testing.assert_allclose(np.asarray(out[:N, :C4]), np.asarray(ref),
                               rtol=3e-2, atol=8e-2)
    print("KERNEL_OK")
</pallas_src>

<mosaic_0001>
module attributes {stable_mosaic.version = 11 : i64} {
  func.func @_mm_stats_kernel(%arg0: i32, %arg1: memref<512x16xbf16, #tpu.memory_space<vmem>>, %arg2: memref<16x128xbf16, #tpu.memory_space<vmem>>, %arg3: memref<512x128xbf16, #tpu.memory_space<vmem>>, %arg4: memref<8x128xf32, #tpu.memory_space<vmem>>) attributes {dimension_semantics = [#tpu.dimension_semantics<parallel>], iteration_bounds = array<i64: 2>, scalar_prefetch = 0 : i64, scratch_operands = 0 : i64, tpu.core_type = #tpu.core_type<tc>, window_params = [{transform_indices = @transform_0, window_bounds = array<i64: 512, 16>}, {pipeline_mode = #tpu.pipeline_mode<synchronous>, transform_indices = @transform_1, window_bounds = array<i64: 16, 128>}, {transform_indices = @transform_2, window_bounds = array<i64: 512, 128>}, {transform_indices = @transform_3, window_bounds = array<i64: 8, 128>}]} {
    %c0 = arith.constant 0 : index
    %c0_0 = arith.constant 0 : index
    %0 = vector.load %arg1[%c0, %c0_0] : memref<512x16xbf16, #tpu.memory_space<vmem>>, vector<512x16xbf16>
    %c0_1 = arith.constant 0 : index
    %c0_2 = arith.constant 0 : index
    %1 = vector.load %arg2[%c0_1, %c0_2] : memref<16x128xbf16, #tpu.memory_space<vmem>>, vector<16x128xbf16>
    %cst = arith.constant dense<0.000000e+00> : vector<512x128xf32>
    %2 = tpu.matmul %0, %1, %cst {dimension_numbers = #tpu.dot_dimension_numbers<[1], [0], [0], [1], [0, 0, 1, 1], [], []>} : vector<512x16xbf16>, vector<16x128xbf16>, vector<512x128xf32> -> vector<512x128xf32>
    %3 = arith.truncf %2 : vector<512x128xf32> to vector<512x128xbf16>
    %c0_3 = arith.constant 0 : index
    %c0_4 = arith.constant 0 : index
    %4 = vector.load %arg3[%c0_3, %c0_4] : memref<512x128xbf16, #tpu.memory_space<vmem>>, vector<512x128xbf16>
    tpu.vector_store %arg3[%c0_3, %c0_4], %3 {strides = array<i32>} : memref<512x128xbf16, #tpu.memory_space<vmem>>, vector<512x128xbf16>,
    %cst_5 = arith.constant dense<0.000000e+00> : vector<128xf32>
    %5 = vector.multi_reduction <add>, %2, %cst_5 [0] : vector<512x128xf32> to vector<128xf32>
    %6 = vector.shape_cast %5 : vector<128xf32> to vector<1x128xf32>
    %7 = arith.mulf %2, %2 : vector<512x128xf32>
    %cst_6 = arith.constant dense<0.000000e+00> : vector<128xf32>
    %8 = vector.multi_reduction <add>, %7, %cst_6 [0] : vector<512x128xf32> to vector<128xf32>
    %9 = vector.shape_cast %8 : vector<128xf32> to vector<1x128xf32>
    %cst_7 = arith.constant 0.000000e+00 : f32
    %10 = vector.broadcast %cst_7 : f32 to vector<6x128xf32>
    %11 = tpu.concatenate %6, %9, %10 in 0 : vector<1x128xf32>, vector<1x128xf32>, vector<6x128xf32> -> vector<8x128xf32>
    %c0_8 = arith.constant 0 : index
    %c0_9 = arith.constant 0 : index
    %12 = vector.load %arg4[%c0_8, %c0_9] : memref<8x128xf32, #tpu.memory_space<vmem>>, vector<8x128xf32>
    tpu.vector_store %arg4[%c0_8, %c0_9], %11 {strides = array<i32>} : memref<8x128xf32, #tpu.memory_space<vmem>>, vector<8x128xf32>,
    return
  }
  func.func @transform_0(%arg0: i32) -> (i32, i32) {
    %c0_i32 = arith.constant 0 : i32
    %c0_i32_0 = arith.constant 0 : i32
    return %arg0, %c0_i32 : i32, i32
  }
  func.func @transform_1(%arg0: i32) -> (i32, i32) {
    %c0_i32 = arith.constant 0 : i32
    %c0_i32_0 = arith.constant 0 : i32
    %c0_i32_1 = arith.constant 0 : i32
    return %c0_i32, %c0_i32_0 : i32, i32
  }
  func.func @transform_2(%arg0: i32) -> (i32, i32) {
    %c0_i32 = arith.constant 0 : i32
    %c0_i32_0 = arith.constant 0 : i32
    return %arg0, %c0_i32 : i32, i32
  }
  func.func @transform_3(%arg0: i32) -> (i32, i32) {
    %c0_i32 = arith.constant 0 : i32
    %c0_i32_0 = arith.constant 0 : i32
    return %arg0, %c0_i32 : i32, i32
  }
}

</mosaic_0001>

<bundles_post_ra>
// kernel: tpu_custom_call.1
= control target key start
LH: loop header
LB: loop body
LE: loop exit
PB: predicated region body
PF: predicated region fallthrough
CT: control target
= control target key end

     0   :  { %9 = vsyncpa [#allocation3], 0  ;;  %s2587_s0 = inlined_call_operand.vmem [shape: bf16[1024,16], index: 0, kind: input, shape index: {}]   ;;  %s2588_s1 = inlined_call_operand.vmem [shape: bf16[16,128], index: 1, kind: input, shape index: {}]   ;;  %s2589_s2 = inlined_call_operand.hbm [shape: bf16[1024,128], index: 2, kind: output, shape index: {0}]   ;;  %s2590_s3 = inlined_call_operand.hbm [shape: f32[16,128], index: 3, kind: output, shape index: {1}]  }
   0x1   :  { %11 = vsyncpa [#allocation3 + $0x1], 0 }
   0x2   :  { %12 = vsyncpa [#allocation5], 0 }
   0x3   :  { %14 = vsyncpa [#allocation5 + $0x1], 0  ;;  %s2155_s12 = smov 0   ;;  %s2157_s13 = smov 0  }
   0x4   :  { %s2159_s14 = smov 0   ;;  %s2161_s15 = smov 0  }
   0x5 LB: > { %s2176_s16 = sadd.s32 4294967295, %s2129_s15   ;;  %s1455_s17 = sadd.s32 4294967294, %s2129_s15   ;;  %s2129_s15 = sphi %s2161_s15, %s2596_s15   ;;  %s2125_s14 = sphi %s2159_s14, %s2595_s14   ;;  %s2121_s13 = sphi %s2157_s13, %s2594_s13   ;;  %s2117_s12 = sphi %s2155_s12, %s2593_s12  }
   0x6   : > { %s2180_s18 = sadd.s32 1, %s2129_s15   ;;  %s74_s19 = sadd.s32 1, %s2125_s14 }
   0x7   : > { %s71_s20 = ssub.s32 %s2129_s15, %s2180_s18  ;;  %p84_p0 = scmp.ne.s32.totalorder %s2125_s14, %s2121_s13 }
   0x8   : > { %p72_p1 = scmp.eq.s32.totalorder %s71_s20, 0  ;;  %p85_p2 = scmp.eq.s32.totalorder %s2176_s16, 1 }
   0x9   : > { %p90_p3 = scmp.ne.s32.totalorder %s2121_s13, %s2117_s12  ;;  %p91_p4 = scmp.eq.s32.totalorder %s1455_s17, 1 }
   0xa   : > { %s2191_s21 = scalar_select %p72_p1, %s2125_s14, %s74_s19  }
   0xb   : > { %p2193_p5 = por %p85_p2, %p84_p0  ;;  %p2197_p6 = por %p91_p4, %p90_p3 }
   0xc   : > { %p1458_p7 = scmp.ge.s32.totalorder %s2129_s15, 1  ;;  %p147_p8 = scmp.lt.s32.totalorder %s2129_s15, 3 }
   0xe   : > { %p148_p9 = pnand %p1458_p7, %p147_p8 }
   0xf   : > { %v2002_v0 = vld [vmem:[%s2588_s1] sm:$0xff] (!%p148_p9)   ;;  %s1461_s26 = sshll.u32 (!%p148_p9), %s2176_s16, 6  ;;  %vm416_vm0 = vcmask (!%p148_p9), 130048   ;;  %s2277_s4 = sand.u32 (!%p148_p9), 1, %s2121_s13  }
  0x10   : > { %151 = sbr.rel (%p148_p9) target bundleno = 410 (0x19a), region = 28  ;;  %p177_p10 = scmp.lt.s32.totalorder (!%p148_p9), %s1461_s26, 127  ;;  %1888 = vmatprep.subr.bf16.mxu0 (!%p148_p9), %v2002_v0  ;;  %1954 = vmatprep.subr.bf16.mxu1 (!%p148_p9), %v2002_v0 }
  0x11   : > { %1889 = vmatpush3.bf16.msra.mxu0 (!%p148_p9), %v2002_v0  ;;  %1955 = vmatpush3.bf16.msra.mxu1 (!%p148_p9), %v2002_v0  ;;  %s1459_s5 = sshll.u32 (!%p148_p9), %s2277_s4, 8  ;;  %s1663_s7 = sshll.u32 (!%p148_p9), %s2176_s16, 12 }
  0x12   : > { %s2280_s6 = scalar_lea.vmem (!%p148_p9), [#allocation2], %s1459_s5  ;;  %s2426_s11 = scalar_lea.hbm (!%p148_p9), %s2589_s2, %s1663_s7 }
  0x13   : > { %s1348_s8 = sshll.u32 (!%p148_p9), %s2280_s6, 4  ;;  %s1330_s17 = scalar_lea.sflag (!%p148_p9), [#allocation3], %s2277_s4  ;;  %s2428_s8 = int_to_ptr.vmem [resolvable:$true] %s1348_s8 }
  0x14   : > { %s2035_s19 = scalar_lea.vmem (!%p148_p9), %s2428_s8, 4096  ;;  %s2131_s20 = smov (!%p148_p9), [#allocation2]  }
  0x15   : > { %p2036_p11 = scmp.ne.s32.totalorder (!%p148_p9), %s2428_s8, %s2035_s19  ;;  %s2039_s24 = sshll.u32 (!%p148_p9), %s2131_s20, 4  ;;  %s2040_s24 = int_to_ptr.vmem [resolvable:$false] %s2039_s24 }
  0x16   : > { %s2041_s25 = scalar_lea.vmem (!%p148_p9), %s2040_s24, 8192  ;;  %p2042_p0 = scmp.lt.s32.totalorder (!%p148_p9), %s2428_s8, %s2040_s24 }
  0x17   : > { %s2598_s26 = smov (!%p177_p10, %s1461_s26), 127  ;;  %p2037_p12 = pnand %p2036_p11, %p2193_p5 }
  0x18   : > { %s1462_s27 = sshll.u32 %s2598_s26, 2  ;;  %p2043_p1 = scmp.lt.s32.totalorder %s2041_s25, %s2035_s19 }
  0x19   : > { %s2210_s30 = scalar_lea.vmem %s2587_s0, %s1462_s27  ;;  %p2038_p13 = pneg %p2037_p12 }
  0x1a   : > { %v2003_v1 = vld [vmem:[%s2210_s30] sm:$0xff]   ;;  %v2004_v2 = vld [vmem:[%s2210_s30 + $0x8] sm:$0xff]   ;;  %v2005_v3 = vld [vmem:[%s2210_s30 + $0x10] sm:$0xff]   ;;  %p2044_p2 = por %p2043_p1, %p2042_p0 }
  0x1b   : > { %1890 = vmatprep.mubr.msk.bf16.mxu0 %vm416_vm0, %v2003_v1  ;;  %v2006_v4 = vld [vmem:[%s2210_s30 + $0x18] sm:$0xff]   ;;  %v2007_v5 = vld [vmem:[%s2210_s30 + $0x20] sm:$0xff]   ;;  %v2008_v6 = vld [vmem:[%s2210_s30 + $0x28] sm:$0xff]  }
  0x1c   : > { %1891 = vmatmul.mubr.msk.bf16.vlgmr.msra.gmra.mrb[0].mxu0 %vm416_vm0, %v2004_v2  ;;  %v2009_v7 = vld [vmem:[%s2210_s30 + $0x30] sm:$0xff]   ;;  %v2019_v8 = vld [vmem:[%s2210_s30 + $0x80] sm:$0xff]   ;;  %v2020_v9 = vld [vmem:[%s2210_s30 + $0x88] sm:$0xff]   ;;  %p2045_p3 = pnand %p2044_p2, %p2038_p13 }
  0x1d   : > { %1894 = vmatprep.mubr.msk.bf16.mxu0 %vm416_vm0, %v2005_v3  ;;  %1922 = vmatprep.mubr.msk.bf16.mxu1 %vm416_vm0, %v2019_v8  ;;  %v2021_v10 = vld [vmem:[%s2210_s30 + $0x90] sm:$0xff]   ;;  %v2010_v11 = vld [vmem:[%s2210_s30 + $0x38] sm:$0xff]   ;;  %v2011_v12 = vld [vmem:[%s2210_s30 + $0x40] sm:$0xff]  }
  0x1e   : > { %1923 = vmatmul.mubr.msk.bf16.vlgmr.msra.gmra.mrb[0].mxu1 %vm416_vm0, %v2020_v9  ;;  %v2022_v13 = vld [vmem:[%s2210_s30 + $0x98] sm:$0xff]   ;;  %v2023_v14 = vld [vmem:[%s2210_s30 + $0xa0] sm:$0xff]   ;;  %v2012_v15 = vld [vmem:[%s2210_s30 + $0x48] sm:$0xff]  }
  0x1f   : > { %1926 = vmatprep.mubr.msk.bf16.mxu1 %vm416_vm0, %v2021_v10  ;;  %v2024_v16 = vld [vmem:[%s2210_s30 + $0xa8] sm:$0xff]   ;;  %v2013_v17 = vld [vmem:[%s2210_s30 + $0x50] sm:$0xff]   ;;  %v2014_v19 = vld [vmem:[%s2210_s30 + $0x58] sm:$0xff]  }
  0x20   : > { %v2025_v18 = vld [vmem:[%s2210_s30 + $0xb0] sm:$0xff]   ;;  %v2026_v20 = vld [vmem:[%s2210_s30 + $0xb8] sm:$0xff]   ;;  %v2015_v21 = vld [vmem:[%s2210_s30 + $0x60] sm:$0xff]  }
  0x21   : > { %v2027_v22 = vld [vmem:[%s2210_s30 + $0xc0] sm:$0xff]   ;;  %v2016_v23 = vld [vmem:[%s2210_s30 + $0x68] sm:$0xff]   ;;  %v2017_v25 = vld [vmem:[%s2210_s30 + $0x70] sm:$0xff]  }
  0x22   : > { %v2028_v24 = vld [vmem:[%s2210_s30 + $0xc8] sm:$0xff]   ;;  %v2029_v26 = vld [vmem:[%s2210_s30 + $0xd0] sm:$0xff]   ;;  %v2018_v27 = vld [vmem:[%s2210_s30 + $0x78] sm:$0xff]  }
  0x23   : > { %v2030_v28 = vld [vmem:[%s2210_s30 + $0xd8] sm:$0xff]   ;;  %v2031_v29 = vld [vmem:[%s2210_s30 + $0xe0] sm:$0xff]   ;;  %v2032_v30 = vld [vmem:[%s2210_s30 + $0xe8] sm:$0xff]  }
  0x24   : > { %1895 = vmatmul.mubr.msk.bf16.gmra.mrb[4].mxu0 %vm416_vm0, %v2006_v4  ;;  %v2033_v31 = vld [vmem:[%s2210_s30 + $0xf0] sm:$0xff]   ;;  %v2034_v32 = vld [vmem:[%s2210_s30 + $0xf8] sm:$0xff]  }
  0x25   : > { %1898 = vmatprep.mubr.msk.bf16.mxu0 %vm416_vm0, %v2007_v5 }
  0x26   : > { %1927 = vmatmul.mubr.msk.bf16.gmra.mrb[4].mxu1 %vm416_vm0, %v2022_v13 }
  0x27   : > { %1930 = vmatprep.mubr.msk.bf16.mxu1 %vm416_vm0, %v2023_v14 }
  0x2c   : > { %1899 = vmatmul.mubr.msk.bf16.gmra.mrb[8].mxu0 %vm416_vm0, %v2008_v6 }
  0x2d   : > { %1902 = vmatprep.mubr.msk.bf16.mxu0 %vm416_vm0, %v2009_v7 }
  0x2e   : > { %1931 = vmatmul.mubr.msk.bf16.gmra.mrb[8].mxu1 %vm416_vm0, %v2024_v16 }
  0x2f   : > { %1934 = vmatprep.mubr.msk.bf16.mxu1 %vm416_vm0, %v2025_v18 }
  0x34   : > { %1903 = vmatmul.mubr.msk.bf16.gmra.mrb[12].mxu0 %vm416_vm0, %v2010_v11 }
  0x35   : > { %1906 = vmatprep.mubr.msk.bf16.mxu0 %vm416_vm0, %v2011_v12 }
  0x36   : > { %1935 = vmatmul.mubr.msk.bf16.gmra.mrb[12].mxu1 %vm416_vm0, %v2026_v20 }
  0x37   : > { %1938 = vmatprep.mubr.msk.bf16.mxu1 %vm416_vm0, %v2027_v22 }
  0x3c   : > { %1907 = vmatmul.mubr.msk.bf16.gmra.mrb[16].mxu0 %vm416_vm0, %v2012_v15 }
  0x3d   : > { %1910 = vmatprep.mubr.msk.bf16.mxu0 %vm416_vm0, %v2013_v17 }
  0x3e   : > { %1939 = vmatmul.mubr.msk.bf16.gmra.mrb[16].mxu1 %vm416_vm0, %v2028_v24 }
  0x3f   : > { %1942 = vmatprep.mubr.msk.bf16.mxu1 %vm416_vm0, %v2029_v26 }
  0x44   : > { %1911 = vmatmul.mubr.msk.bf16.gmra.mrb[20].mxu0 %vm416_vm0, %v2014_v19 }
  0x45   : > { %1914 = vmatprep.mubr.msk.bf16.mxu0 %vm416_vm0, %v2015_v21 }
  0x46   : > { %1943 = vmatmul.mubr.msk.bf16.gmra.mrb[20].mxu1 %vm416_vm0, %v2030_v28 }
  0x47   : > { %1946 = vmatprep.mubr.msk.bf16.mxu1 %vm416_vm0, %v2031_v29 }
  0x4c   : > { %1915 = vmatmul.mubr.msk.bf16.gmra.mrb[24].mxu0 %vm416_vm0, %v2016_v23 }
  0x4d   : > { %1918 = vmatprep.mubr.msk.bf16.mxu0 %vm416_vm0, %v2017_v25 }
  0x4e   : > { %1947 = vmatmul.mubr.msk.bf16.gmra.mrb[24].mxu1 %vm416_vm0, %v2032_v30 }
  0x4f   : > { %1950 = vmatprep.mubr.msk.bf16.mxu1 %vm416_vm0, %v2033_v31 }
  0x54   : > { %1919 = vmatmul.mubr.msk.bf16.gmra.mrb[28].mxu0 %vm416_vm0, %v2018_v27 }
  0x56   : > { %1951 = vmatmul.mubr.msk.bf16.gmra.mrb[28].mxu1 %vm416_vm0, %v2034_v32 }
  0xef   : > { %v1892_v33 = vpop.f32.mrb[0].mxu0 }
  0xf0   : > { %v547_v34 = vpop.f32.mrb[1].mxu0  ;;  %v1193_v42 = vmul.f32 %v1892_v33, %v1892_v33 }
  0xf1   : > { %v1893_v35 = vpop.f32.mrb[2].mxu0  ;;  %v1191_v38 = vmul.f32 %v547_v34, %v547_v34  ;;  %v2286_v3 = vpop.f32.mrb[0].mxu1 }
  0xf2   : > { %v1672_v36 = vpack.c.bf16 %v1893_v35, %v1892_v33  ;;  %v550_v37 = vpop.f32.mrb[3].mxu0  ;;  %v1194_v45 = vmul.f32 %v1893_v35, %v1893_v35  ;;  %v2288_v5 = vpop.f32.mrb[1].mxu1 }
  0xf3   : > { %v1667_v39 = vpack.c.bf16 %v550_v37, %v547_v34  ;;  %v1122_v40 = vadd.f32 %v550_v37, %v547_v34  ;;  %v1192_v41 = vmul.f32 %v550_v37, %v550_v37  ;;  %v2290_v10 = vpop.f32.mrb[2].mxu1 }
  0xf4   : > { %1824 = vst [vmem:[%s2280_s6 + $0x8] sm:$0xff] %v1672_v36   ;;  %v1752_v13 = vpack.c.bf16 %v2290_v10, %v2286_v3  ;;  %v2294_v14 = vpop.f32.mrb[3].mxu1 }
  0xf5   : > { %1668 = vst [vmem:[%s2280_s6] sm:$0xff] %v1667_v39   ;;  %v1123_v43 = vadd.f32 %v1892_v33, %v1122_v40  ;;  %v1255_v44 = vadd.f32 %v1192_v41, %v1191_v38  ;;  %v1747_v19 = vpack.c.bf16 %v2294_v14, %v2288_v5 }
  0xf6   : > { %1840 = vst [vmem:[%s2280_s6 + $0x88] sm:$0xff] %v1752_v13  }
  0xf7   : > { %v1256_v46 = vadd.f32 %v1255_v44, %v1193_v42  ;;  %v1896_v47 = vpop.f32.mrb[4].mxu0  ;;  %v1124_v48 = vadd.f32 %v1893_v35, %v1123_v43  ;;  %1839 = vst [vmem:[%s2280_s6 + $0x80] sm:$0xff] %v1747_v19  }
  0xf8   : > { %v563_v49 = vpop.f32.mrb[5].mxu0  ;;  %v1197_v60 = vmul.f32 %v1896_v47, %v1896_v47 }
  0xf9   : > { %v1125_v50 = vadd.f32 %v1124_v48, %v563_v49  ;;  %v1195_v51 = vmul.f32 %v563_v49, %v563_v49  ;;  %v1257_v52 = vadd.f32 %v1256_v46, %v1194_v45  ;;  %v1897_v53 = vpop.f32.mrb[6].mxu0  ;;  %v2302_v27 = vpop.f32.mrb[4].mxu1 }
  0xfa   : > { %v1682_v54 = vpack.c.bf16 %v1897_v53, %v1896_v47  ;;  %v566_v55 = vpop.f32.mrb[7].mxu0  ;;  %v1198_v63 = vmul.f32 %v1897_v53, %v1897_v53  ;;  %v2304_v29 = vpop.f32.mrb[5].mxu1 }
  0xfb   : > { %v1258_v56 = vadd.f32 %v1257_v52, %v1195_v51  ;;  %v1677_v57 = vpack.c.bf16 %v566_v55, %v563_v49  ;;  %v1126_v58 = vadd.f32 %v1125_v50, %v566_v55  ;;  %v1196_v59 = vmul.f32 %v566_v55, %v566_v55  ;;  %v2306_v34 = vpop.f32.mrb[6].mxu1 }
  0xfc   : > { %1826 = vst [vmem:[%s2280_s6 + $0x18] sm:$0xff] %v1682_v54   ;;  %v1762_v37 = vpack.c.bf16 %v2306_v34, %v2302_v27  ;;  %v2310_v38 = vpop.f32.mrb[7].mxu1 }
  0xfd   : > { %1825 = vst [vmem:[%s2280_s6 + $0x10] sm:$0xff] %v1677_v57   ;;  %v1127_v61 = vadd.f32 %v1896_v47, %v1126_v58  ;;  %v1259_v62 = vadd.f32 %v1258_v56, %v1196_v59  ;;  %v1757_v43 = vpack.c.bf16 %v2310_v38, %v2304_v29 }
  0xfe   : > { %1842 = vst [vmem:[%s2280_s6 + $0x98] sm:$0xff] %v1762_v37  }
  0xff   : > { %v1260_v0 = vadd.f32 %v1259_v62, %v1197_v60  ;;  %v1900_v1 = vpop.f32.mrb[8].mxu0  ;;  %v1128_v2 = vadd.f32 %v1897_v53, %v1127_v61  ;;  %1841 = vst [vmem:[%s2280_s6 + $0x90] sm:$0xff] %v1757_v43  }
 0x100   : > { %v579_v4 = vpop.f32.mrb[9].mxu0  ;;  %v1201_v20 = vmul.f32 %v1900_v1, %v1900_v1 }
 0x101   : > { %v1129_v6 = vadd.f32 %v1128_v2, %v579_v4  ;;  %v1199_v7 = vmul.f32 %v579_v4, %v579_v4  ;;  %v1261_v8 = vadd.f32 %v1260_v0, %v1198_v63  ;;  %v1901_v9 = vpop.f32.mrb[10].mxu0  ;;  %v2318_v51 = vpop.f32.mrb[8].mxu1 }
 0x102   : > { %v1692_v11 = vpack.c.bf16 %v1901_v9, %v1900_v1  ;;  %v582_v12 = vpop.f32.mrb[11].mxu0  ;;  %v1202_v23 = vmul.f32 %v1901_v9, %v1901_v9  ;;  %v2320_v53 = vpop.f32.mrb[9].mxu1 }
 0x103   : > { %v1262_v15 = vadd.f32 %v1261_v8, %v1199_v7  ;;  %v1687_v16 = vpack.c.bf16 %v582_v12, %v579_v4  ;;  %v1130_v17 = vadd.f32 %v1129_v6, %v582_v12  ;;  %v1200_v18 = vmul.f32 %v582_v12, %v582_v12  ;;  %v2322_v58 = vpop.f32.mrb[10].mxu1 }
 0x104   : > { %1828 = vst [vmem:[%s2280_s6 + $0x28] sm:$0xff] %v1692_v11   ;;  %v1772_v61 = vpack.c.bf16 %v2322_v58, %v2318_v51  ;;  %v2326_v62 = vpop.f32.mrb[11].mxu1 }
 0x105   : > { %1827 = vst [vmem:[%s2280_s6 + $0x20] sm:$0xff] %v1687_v16   ;;  %v1131_v21 = vadd.f32 %v1900_v1, %v1130_v17  ;;  %v1263_v22 = vadd.f32 %v1262_v15, %v1200_v18  ;;  %v1767_v4 = vpack.c.bf16 %v2326_v62, %v2320_v53 }
 0x106   : > { %1844 = vst [vmem:[%s2280_s6 + $0xa8] sm:$0xff] %v1772_v61  }
 0x107   : > { %v1264_v24 = vadd.f32 %v1263_v22, %v1201_v20  ;;  %v1904_v25 = vpop.f32.mrb[12].mxu0  ;;  %v1132_v26 = vadd.f32 %v1901_v9, %v1131_v21  ;;  %1843 = vst [vmem:[%s2280_s6 + $0xa0] sm:$0xff] %v1767_v4  }
 0x108   : > { %v595_v28 = vpop.f32.mrb[13].mxu0  ;;  %v1205_v44 = vmul.f32 %v1904_v25, %v1904_v25 }
 0x109   : > { %v1133_v30 = vadd.f32 %v1132_v26, %v595_v28  ;;  %v1203_v31 = vmul.f32 %v595_v28, %v595_v28  ;;  %v1265_v32 = vadd.f32 %v1264_v24, %v1202_v23  ;;  %v1905_v33 = vpop.f32.mrb[14].mxu0  ;;  %v2334_v15 = vpop.f32.mrb[12].mxu1 }
 0x10a   : > { %v1702_v35 = vpack.c.bf16 %v1905_v33, %v1904_v25  ;;  %v598_v36 = vpop.f32.mrb[15].mxu0  ;;  %v1206_v47 = vmul.f32 %v1905_v33, %v1905_v33  ;;  %v2336_v17 = vpop.f32.mrb[13].mxu1 }
 0x10b   : > { %v1266_v39 = vadd.f32 %v1265_v32, %v1203_v31  ;;  %v1697_v40 = vpack.c.bf16 %v598_v36, %v595_v28  ;;  %v1134_v41 = vadd.f32 %v1133_v30, %v598_v36  ;;  %v1204_v42 = vmul.f32 %v598_v36, %v598_v36  ;;  %v2338_v22 = vpop.f32.mrb[14].mxu1 }
 0x10c   : > { %1830 = vst [vmem:[%s2280_s6 + $0x38] sm:$0xff] %v1702_v35   ;;  %v2342_v26 = vpop.f32.mrb[15].mxu1 }
 0x10d   : > { %1829 = vst [vmem:[%s2280_s6 + $0x30] sm:$0xff] %v1697_v40   ;;  %v1135_v45 = vadd.f32 %v1904_v25, %v1134_v41  ;;  %v1267_v46 = vadd.f32 %v1266_v39, %v1204_v42  ;;  %v1782_v25 = vpack.c.bf16 %v2338_v22, %v2334_v15 }
 0x10f   : > { %v1268_v48 = vadd.f32 %v1267_v46, %v1205_v44  ;;  %v1908_v49 = vpop.f32.mrb[16].mxu0  ;;  %v1136_v50 = vadd.f32 %v1905_v33, %v1135_v45  ;;  %1846 = vst [vmem:[%s2280_s6 + $0xb8] sm:$0xff] %v1782_v25   ;;  %v1777_v33 = vpack.c.bf16 %v2342_v26, %v2336_v17 }
 0x110   : > { %v611_v52 = vpop.f32.mrb[17].mxu0  ;;  %v1209_v6 = vmul.f32 %v1908_v49, %v1908_v49 }
 0x111   : > { %v1137_v54 = vadd.f32 %v1136_v50, %v611_v52  ;;  %v1207_v55 = vmul.f32 %v611_v52, %v611_v52  ;;  %v1269_v56 = vadd.f32 %v1268_v48, %v1206_v47  ;;  %v1909_v57 = vpop.f32.mrb[18].mxu0  ;;  %1845 = vst [vmem:[%s2280_s6 + $0xb0] sm:$0xff] %v1777_v33   ;;  %v2350_v43 = vpop.f32.mrb[16].mxu1 }
 0x112   : > { %v1712_v59 = vpack.c.bf16 %v1909_v57, %v1908_v49  ;;  %v614_v60 = vpop.f32.mrb[19].mxu0  ;;  %v1210_v9 = vmul.f32 %v1909_v57, %v1909_v57  ;;  %v2352_v45 = vpop.f32.mrb[17].mxu1 }
 0x113   : > { %v1270_v63 = vadd.f32 %v1269_v56, %v1207_v55  ;;  %v1707_v0 = vpack.c.bf16 %v614_v60, %v611_v52  ;;  %v1138_v1 = vadd.f32 %v1137_v54, %v614_v60  ;;  %v1208_v2 = vmul.f32 %v614_v60, %v614_v60  ;;  %v2354_v50 = vpop.f32.mrb[18].mxu1 }
 0x114   : > { %1832 = vst [vmem:[%s2280_s6 + $0x48] sm:$0xff] %v1712_v59   ;;  %v1792_v55 = vpack.c.bf16 %v2354_v50, %v2350_v43  ;;  %v2358_v56 = vpop.f32.mrb[19].mxu1 }
 0x115   : > { %1831 = vst [vmem:[%s2280_s6 + $0x40] sm:$0xff] %v1707_v0   ;;  %v1139_v7 = vadd.f32 %v1908_v49, %v1138_v1  ;;  %v1271_v8 = vadd.f32 %v1270_v63, %v1208_v2  ;;  %v1787_v63 = vpack.c.bf16 %v2358_v56, %v2352_v45 }
 0x116   : > { %1848 = vst [vmem:[%s2280_s6 + $0xc8] sm:$0xff] %v1792_v55  }
 0x117   : > { %v1272_v11 = vadd.f32 %v1271_v8, %v1209_v6  ;;  %v1912_v12 = vpop.f32.mrb[20].mxu0  ;;  %v1140_v13 = vadd.f32 %v1909_v57, %v1139_v7  ;;  %1847 = vst [vmem:[%s2280_s6 + $0xc0] sm:$0xff] %v1787_v63  }
 0x118   : > { %v627_v16 = vpop.f32.mrb[21].mxu0  ;;  %v1213_v35 = vmul.f32 %v1912_v12, %v1912_v12 }
 0x119   : > { %v1141_v18 = vadd.f32 %v1140_v13, %v627_v16  ;;  %v1211_v19 = vmul.f32 %v627_v16, %v627_v16  ;;  %v1273_v20 = vadd.f32 %v1272_v11, %v1210_v9  ;;  %v1913_v21 = vpop.f32.mrb[22].mxu0  ;;  %v2366_v9 = vpop.f32.mrb[20].mxu1 }
 0x11a   : > { %v1722_v23 = vpack.c.bf16 %v1913_v21, %v1912_v12  ;;  %v630_v24 = vpop.f32.mrb[23].mxu0  ;;  %v1214_v39 = vmul.f32 %v1913_v21, %v1913_v21 }
 0x11b   : > { %v1274_v28 = vadd.f32 %v1273_v20, %v1211_v19  ;;  %v1717_v30 = vpack.c.bf16 %v630_v24, %v627_v16  ;;  %v1142_v31 = vadd.f32 %v1141_v18, %v630_v24  ;;  %v1212_v32 = vmul.f32 %v630_v24, %v630_v24 }
 0x11c   : > { %1834 = vst [vmem:[%s2280_s6 + $0x58] sm:$0xff] %v1722_v23  }
 0x11d   : > { %1833 = vst [vmem:[%s2280_s6 + $0x50] sm:$0xff] %v1717_v30   ;;  %v1143_v36 = vadd.f32 %v1912_v12, %v1142_v31  ;;  %v1275_v37 = vadd.f32 %v1274_v28, %v1212_v32  ;;  %v2368_v12 = vpop.f32.mrb[21].mxu1 }
 0x11e   : > { %v2370_v20 = vpop.f32.mrb[22].mxu1 }
 0x11f   : > { %v1276_v40 = vadd.f32 %v1275_v37, %v1213_v35  ;;  %v1916_v41 = vpop.f32.mrb[24].mxu0  ;;  %v1144_v42 = vadd.f32 %v1913_v21, %v1143_v36  ;;  %v1802_v24 = vpack.c.bf16 %v2370_v20, %v2366_v9  ;;  %v2374_v25 = vpop.f32.mrb[23].mxu1 }
 0x120   : > { %v643_v44 = vpop.f32.mrb[25].mxu0  ;;  %v1217_v0 = vmul.f32 %v1916_v41, %v1916_v41  ;;  %v1797_v33 = vpack.c.bf16 %v2374_v25, %v2368_v12 }
 0x121   : > { %v1145_v46 = vadd.f32 %v1144_v42, %v643_v44  ;;  %v1215_v47 = vmul.f32 %v643_v44, %v643_v44  ;;  %v1277_v48 = vadd.f32 %v1276_v40, %v1214_v39  ;;  %v1917_v49 = vpop.f32.mrb[26].mxu0  ;;  %1850 = vst [vmem:[%s2280_s6 + $0xd8] sm:$0xff] %v1802_v24   ;;  %v1223_v42 = vmul.f32 %v2288_v5, %v2288_v5 }
 0x122   : > { %v1732_v52 = vpack.c.bf16 %v1917_v49, %v1916_v41  ;;  %v646_v54 = vpop.f32.mrb[27].mxu0  ;;  %v1218_v4 = vmul.f32 %v1917_v49, %v1917_v49  ;;  %1849 = vst [vmem:[%s2280_s6 + $0xd0] sm:$0xff] %v1797_v33  }
 0x123   : > { %v1278_v57 = vadd.f32 %v1277_v48, %v1215_v47  ;;  %v1727_v59 = vpack.c.bf16 %v646_v54, %v643_v44  ;;  %v1146_v60 = vadd.f32 %v1145_v46, %v646_v54  ;;  %v1216_v61 = vmul.f32 %v646_v54, %v646_v54  ;;  %v2384_v44 = vpop.f32.mrb[24].mxu1 }
 0x124   : > { %1836 = vst [vmem:[%s2280_s6 + $0x68] sm:$0xff] %v1732_v52   ;;  %v2386_v46 = vpop.f32.mrb[25].mxu1 }
 0x125   : > { %1835 = vst [vmem:[%s2280_s6 + $0x60] sm:$0xff] %v1727_v59   ;;  %v1147_v1 = vadd.f32 %v1916_v41, %v1146_v60  ;;  %v1279_v2 = vadd.f32 %v1278_v57, %v1216_v61  ;;  %v1224_v59 = vmul.f32 %v2294_v14, %v2294_v14 }
 0x127   : > { %v1280_v6 = vadd.f32 %v1279_v2, %v1217_v0  ;;  %v1920_v7 = vpop.f32.mrb[28].mxu0  ;;  %v1148_v8 = vadd.f32 %v1917_v49, %v1147_v1  ;;  %v2389_v49 = vpop.f32.mrb[26].mxu1  ;;  %v1226_v0 = vmul.f32 %v2290_v10, %v2290_v10 }
 0x128   : > { %v659_v11 = vpop.f32.mrb[29].mxu0  ;;  %v1221_v35 = vmul.f32 %v1920_v7, %v1920_v7  ;;  %v1812_v52 = vpack.c.bf16 %v2389_v49, %v2384_v44  ;;  %v2393_v54 = vpop.f32.mrb[27].mxu1 }
 0x129   : > { %v1149_v13 = vadd.f32 %v1148_v8, %v659_v11  ;;  %v1219_v16 = vmul.f32 %v659_v11, %v659_v11  ;;  %v1281_v18 = vadd.f32 %v1280_v6, %v1218_v4  ;;  %v1921_v19 = vpop.f32.mrb[30].mxu0  ;;  %v1807_v60 = vpack.c.bf16 %v2393_v54, %v2386_v46  ;;  %v2410_v4 = vpop.f32.mrb[28].mxu1 }
 0x12a   : > { %v1742_v21 = vpack.c.bf16 %v1921_v19, %v1920_v7  ;;  %v662_v23 = vpop.f32.mrb[31].mxu0  ;;  %v1222_v39 = vmul.f32 %v1921_v19, %v1921_v19  ;;  %1852 = vst [vmem:[%s2280_s6 + $0xe8] sm:$0xff] %v1812_v52   ;;  %v2414_v6 = vpop.f32.mrb[29].mxu1 }
 0x12b   : > { %v1282_v28 = vadd.f32 %v1281_v18, %v1219_v16  ;;  %v1737_v30 = vpack.c.bf16 %v662_v23, %v659_v11  ;;  %v1150_v31 = vadd.f32 %v1149_v13, %v662_v23  ;;  %v1220_v32 = vmul.f32 %v662_v23, %v662_v23  ;;  %1851 = vst [vmem:[%s2280_s6 + $0xe0] sm:$0xff] %v1807_v60   ;;  %v2417_v8 = vpop.f32.mrb[30].mxu1 }
 0x12c   : > { %1838 = vst [vmem:[%s2280_s6 + $0x78] sm:$0xff] %v1742_v21   ;;  %v2421_v11 = vpop.f32.mrb[31].mxu1  ;;  %v1228_v16 = vmul.f32 %v2310_v38, %v2310_v38 }
 0x12d   : > { %1837 = vst [vmem:[%s2280_s6 + $0x70] sm:$0xff] %v1737_v30   ;;  %v1151_v36 = vadd.f32 %v1920_v7, %v1150_v31  ;;  %v1283_v37 = vadd.f32 %v1282_v28, %v1220_v32  ;;  %v1817_v18 = vpack.c.bf16 %v2421_v11, %v2414_v6 }
 0x12f   : > { %v1284_v40 = vadd.f32 %v1283_v37, %v1221_v35  ;;  %v1152_v41 = vadd.f32 %v1921_v19, %v1151_v36  ;;  %v1229_v19 = vmul.f32 %v2302_v27, %v2302_v27  ;;  %1853 = vst [vmem:[%s2280_s6 + $0xf0] sm:$0xff] %v1817_v18  }
 0x131   : > { %v1153_v47 = vadd.f32 %v1152_v41, %v2288_v5  ;;  %v1285_v48 = vadd.f32 %v1284_v40, %v1222_v39  ;;  %v1225_v5 = vmul.f32 %v2286_v3, %v2286_v3 }
 0x133   : > { %v1286_v55 = vadd.f32 %v1285_v48, %v1223_v42  ;;  %v1154_v57 = vadd.f32 %v1153_v47, %v2294_v14  ;;  %v1227_v14 = vmul.f32 %v2304_v29, %v2304_v29 }
 0x135   : > { %v1155_v61 = vadd.f32 %v2286_v3, %v1154_v57  ;;  %v1287_v63 = vadd.f32 %v1286_v55, %v1224_v59 }
 0x137   : > { %v1288_v1 = vadd.f32 %v1287_v63, %v1225_v5  ;;  %v1156_v2 = vadd.f32 %v2290_v10, %v1155_v61  ;;  %v1822_v10 = vpack.c.bf16 %v2417_v8, %v2410_v4 }
 0x139   : > { %v1157_v3 = vadd.f32 %v1156_v2, %v2304_v29  ;;  %v1289_v7 = vadd.f32 %v1288_v1, %v1226_v0  ;;  %1854 = vst [vmem:[%s2280_s6 + $0xf8] sm:$0xff] %v1822_v10  }
 0x13b   : > { %v1290_v29 = vadd.f32 %v1289_v7, %v1227_v14  ;;  %v1158_v13 = vadd.f32 %v1157_v3, %v2310_v38 }
 0x13d   : > { %v1159_v21 = vadd.f32 %v2302_v27, %v1158_v13  ;;  %v1291_v23 = vadd.f32 %v1290_v29, %v1228_v16 }
 0x13e   : > { %2048 = shalt.err (!%p2045_p3)
}
 0x13f   : > { %s2049_s26 = scalar_lea.hbm %s2426_s11, 4096  ;;  %s2053_s29 = scalar_lea.hbm %s2589_s2, 8192 }
 0x140   : > { %p2050_p4 = scmp.ne.s32.totalorder %s2426_s11, %s2049_s26  ;;  %p2054_p9 = scmp.lt.u32.totalorder %s2426_s11, %s2589_s2 }
 0x141   : > { %p2055_p10 = scmp.lt.u32.totalorder %s2053_s29, %s2049_s26  ;;  %p2057_p12 = scmp.lt.u32.totalorder %s2049_s26, %s2426_s11 }
 0x142   : > { %p2051_p7 = pnand %p2050_p4, %p2193_p5 }
 0x143   : > { %p2056_p11 = por %p2055_p10, %p2054_p9 }
 0x144   : > { %p2052_p8 = pneg %p2051_p7 }
 0x145   : > { %p2058_p13 = por %p2057_p12, %p2056_p11 }
 0x147   : > { %p2059_p0 = pnand %p2058_p13, %p2052_p8 }
 0x149   : > { %2062 = shalt.err (!%p2059_p0)
}
 0x14a   : > { %s2132_s6 = smov 64   ;;  %s2133_s7 = smov 4   ;;  %v1230_v27 = vmul.f32 %v2306_v34, %v2306_v34  ;;  %v1292_v38 = vadd.f32 %v1291_v23, %v1229_v19  ;;  %v1160_v24 = vadd.f32 %v2306_v34, %v1159_v21  ;;  %v1231_v28 = vmul.f32 %v2320_v53, %v2320_v53 }
 0x14b   : > { %1956 = dma.vmem_to_hbm [thread:$0]  (%p2193_p5), %s2428_s8, 4096, %s2426_s11, %s1330_s17, %s2132_s6, %s2132_s6, %s2133_s7   ;;  %v1232_v35 = vmul.f32 %v2326_v62, %v2326_v62  ;;  %v1233_v36 = vmul.f32 %v2318_v51, %v2318_v51  ;;  %v1234_v34 = vmul.f32 %v2322_v58, %v2322_v58  ;;  %v1236_v52 = vmul.f32 %v2342_v26, %v2342_v26 }
 0x14c   : > { %v1161_v30 = vadd.f32 %v1160_v24, %v2320_v53  ;;  %v1293_v31 = vadd.f32 %v1292_v38, %v1230_v27  ;;  %v1235_v53 = vmul.f32 %v2336_v17, %v2336_v17  ;;  %v1240_v0 = vmul.f32 %v2358_v56, %v2358_v56  ;;  %s1460_s8 = sshll.u32 %s2277_s4, 3  ;;  %s1596_s9 = sshll.u32 %s2176_s16, 7 }
 0x14d   : > { %v1244_v13 = vmul.f32 %v2374_v25, %v2374_v25  ;;  %v1248_v24 = vmul.f32 %v2393_v54, %v2393_v54  ;;  %vm1324_vm1 = vcmask 1040384   ;;  %s175_s10 = scalar_lea.vmem [#allocation4], %s1460_s8  ;;  %vm1326_vm2 = vcmask 1041408   ;;  %s2544_s20 = scalar_lea.hbm %s2590_s3, %s1596_s9 }
 0x14e   : > { %v1294_v32 = vadd.f32 %v1293_v31, %v1231_v28  ;;  %v1162_v33 = vadd.f32 %v1161_v30, %v2326_v62  ;;  %s1364_s11 = sshll.u32 %s175_s10, 4  ;;  %s1335_s24 = scalar_lea.sflag [#allocation5], %s2277_s4  ;;  %s2546_s11 = int_to_ptr.vmem [resolvable:$true] %s1364_s11 }
 0x14f   : > { %s2063_s16 = scalar_lea.vmem %s2546_s11, 128  ;;  %s2134_s25 = smov [#allocation4]  }
 0x150   : > { %v1163_v37 = vadd.f32 %v2318_v51, %v1162_v33  ;;  %v1295_v39 = vadd.f32 %v1294_v32, %v1232_v35  ;;  %v1237_v51 = vmul.f32 %v2334_v15, %v2334_v15  ;;  %p2064_p1 = scmp.ne.s32.totalorder %s2546_s11, %s2063_s16  ;;  %s2067_s26 = sshll.u32 %s2134_s25, 4  ;;  %s2068_s26 = int_to_ptr.vmem [resolvable:$false] %s2067_s26 }
 0x151   : > { %s2069_s27 = scalar_lea.vmem %s2068_s26, 256  ;;  %p2070_p4 = scmp.lt.s32.totalorder %s2546_s11, %s2068_s26 }
 0x152   : > { %v1296_v40 = vadd.f32 %v1295_v39, %v1233_v36  ;;  %v1164_v41 = vadd.f32 %v2322_v58, %v1163_v37  ;;  %v1238_v58 = vmul.f32 %v2338_v22, %v2338_v22  ;;  %v1253_v37 = vmul.f32 %v2410_v4, %v2410_v4  ;;  %p2065_p2 = pnand %p2064_p1, %p2193_p5  ;;  %p2071_p7 = scmp.lt.s32.totalorder %s2069_s27, %s2063_s16 }
 0x154   : > { %v1165_v42 = vadd.f32 %v1164_v41, %v2336_v17  ;;  %v1297_v47 = vadd.f32 %v1296_v40, %v1234_v34  ;;  %v1239_v17 = vmul.f32 %v2352_v45, %v2352_v45  ;;  %p2066_p3 = pneg %p2065_p2  ;;  %p2072_p8 = por %p2071_p7, %p2070_p4 }
 0x156   : > { %v1298_v48 = vadd.f32 %v1297_v47, %v1235_v53  ;;  %v1166_v62 = vadd.f32 %v1165_v42, %v2342_v26  ;;  %p2073_p9 = pnand %p2072_p8, %p2066_p3 }
 0x158   : > { %v1167_v55 = vadd.f32 %v2334_v15, %v1166_v62  ;;  %v1299_v57 = vadd.f32 %v1298_v48, %v1236_v52  ;;  %v1241_v15 = vmul.f32 %v2350_v43, %v2350_v43 }
 0x15a   : > { %v1300_v59 = vadd.f32 %v1299_v57, %v1237_v51  ;;  %v1168_v60 = vadd.f32 %v2338_v22, %v1167_v55  ;;  %v1242_v22 = vmul.f32 %v2354_v50, %v2354_v50 }
 0x15c   : > { %v1169_v5 = vadd.f32 %v1168_v60, %v2352_v45  ;;  %v1301_v61 = vadd.f32 %v1300_v59, %v1238_v58  ;;  %v1243_v45 = vmul.f32 %v2368_v12, %v2368_v12 }
 0x15e   : > { %v1302_v63 = vadd.f32 %v1301_v61, %v1239_v17  ;;  %v1170_v26 = vadd.f32 %v1169_v5, %v2358_v56 }
 0x160   : > { %v1171_v1 = vadd.f32 %v2350_v43, %v1170_v26  ;;  %v1303_v2 = vadd.f32 %v1302_v63, %v1240_v0  ;;  %v1245_v43 = vmul.f32 %v2366_v9, %v2366_v9 }
 0x162   : > { %v1304_v14 = vadd.f32 %v1303_v2, %v1241_v15  ;;  %v1172_v3 = vadd.f32 %v2354_v50, %v1171_v1  ;;  %v1246_v50 = vmul.f32 %v2370_v20, %v2370_v20 }
 0x164   : > { %v1173_v7 = vadd.f32 %v1172_v3, %v2368_v12  ;;  %v1305_v10 = vadd.f32 %v1304_v14, %v1242_v22  ;;  %v1247_v12 = vmul.f32 %v2386_v46, %v2386_v46 }
 0x166   : > { %v1306_v29 = vadd.f32 %v1305_v10, %v1243_v45  ;;  %v1174_v56 = vadd.f32 %v1173_v7, %v2374_v25 }
 0x168   : > { %v1175_v16 = vadd.f32 %v2366_v9, %v1174_v56  ;;  %v1307_v18 = vadd.f32 %v1306_v29, %v1244_v13  ;;  %v1249_v9 = vmul.f32 %v2384_v44, %v2384_v44 }
 0x16a   : > { %v1308_v19 = vadd.f32 %v1307_v18, %v1245_v43  ;;  %v1176_v21 = vadd.f32 %v2370_v20, %v1175_v16  ;;  %v1250_v20 = vmul.f32 %v2389_v49, %v2389_v49 }
 0x16c   : > { %v1177_v23 = vadd.f32 %v1176_v21, %v2386_v46  ;;  %v1309_v27 = vadd.f32 %v1308_v19, %v1246_v50  ;;  %v1251_v46 = vmul.f32 %v2414_v6, %v2414_v6 }
 0x16e   : > { %v1310_v38 = vadd.f32 %v1309_v27, %v1247_v12  ;;  %v1178_v25 = vadd.f32 %v1177_v23, %v2393_v54 }
 0x170   : > { %v1179_v28 = vadd.f32 %v2384_v44, %v1178_v25  ;;  %v1311_v30 = vadd.f32 %v1310_v38, %v1248_v24  ;;  %v1252_v44 = vmul.f32 %v2421_v11, %v2421_v11 }
 0x172   : > { %v1312_v31 = vadd.f32 %v1311_v30, %v1249_v9  ;;  %v1180_v32 = vadd.f32 %v2389_v49, %v1179_v28  ;;  %v1254_v49 = vmul.f32 %v2417_v8, %v2417_v8 }
 0x174   : > { %v1181_v33 = vadd.f32 %v1180_v32, %v2414_v6  ;;  %v1313_v35 = vadd.f32 %v1312_v31, %v1250_v20 }
 0x176   : > { %v1314_v54 = vadd.f32 %v1313_v35, %v1251_v46  ;;  %v1182_v36 = vadd.f32 %v1181_v33, %v2421_v11 }
 0x178   : > { %v1183_v39 = vadd.f32 %v2410_v4, %v1182_v36  ;;  %v1315_v34 = vadd.f32 %v1314_v54, %v1252_v44 }
 0x17a   : > { %v1184_v6 = vadd.f32 %v2417_v8, %v1183_v39  ;;  %v1316_v40 = vadd.f32 %v1315_v34, %v1253_v37 }
 0x17c   : > { %v1185_v41 = vrot.slane %v1184_v6, 4  ;;  %v1317_v53 = vadd.f32 %v1316_v40, %v1254_v49 }
 0x17e   : > { %v1186_v42 = vadd.f32 %v1185_v41, %v1184_v6  ;;  %v1318_v47 = vrot.slane %v1317_v53, 4 }
 0x180   : > { %v1187_v48 = vrot.slane %v1186_v42, 2  ;;  %v1319_v62 = vadd.f32 %v1318_v47, %v1317_v53 }
 0x182   : > { %v1188_v11 = vadd.f32 %v1187_v48, %v1186_v42  ;;  %v1320_v52 = vrot.slane %v1319_v62, 2 }
 0x184   : > { %v1189_v51 = vrot.slane %v1188_v11, 1  ;;  %v1321_v4 = vadd.f32 %v1320_v52, %v1319_v62 }
 0x186   : > { %v1322_v55 = vrot.slane %v1321_v4, 1  ;;  %v1190_v8 = vadd.f32 %v1189_v51, %v1188_v11 }
 0x188   : > { %v1323_v57 = vadd.f32 %v1322_v55, %v1321_v4 }
 0x18a   : > { %v1325_v58 = vsel %vm1324_vm1, %v1190_v8, %v1323_v57 }
 0x18b   : > { %v1327_v59 = vsel %vm1326_vm2, %v1325_v58, 0.0 }
 0x18c   : > { %1328 = vst [vmem:[%s175_s10] sm:$0xff] %v1327_v59 }
 0x18d   : > { %2076 = shalt.err (!%p2073_p9)
}
 0x18e   : > { %s2077_s4 = scalar_lea.hbm %s2544_s20, 128  ;;  %s2081_s30 = scalar_lea.hbm %s2590_s3, 256 }
 0x18f   : > { %p2078_p10 = scmp.ne.s32.totalorder %s2544_s20, %s2077_s4  ;;  %p2082_p13 = scmp.lt.u32.totalorder %s2544_s20, %s2590_s3 }
 0x190   : > { %p2083_p0 = scmp.lt.u32.totalorder %s2081_s30, %s2077_s4  ;;  %p2085_p2 = scmp.lt.u32.totalorder %s2077_s4, %s2544_s20 }
 0x191   : > { %p2079_p11 = pnand %p2078_p10, %p2193_p5 }
 0x192   : > { %p2084_p1 = por %p2083_p0, %p2082_p13 }
 0x193   : > { %p2080_p12 = pneg %p2079_p11 }
 0x194   : > { %p2086_p3 = por %p2085_p2, %p2084_p1 }
 0x196   : > { %p2087_p4 = pnand %p2086_p3, %p2080_p12 }
 0x198   : > { %2090 = shalt.err (!%p2087_p4)
}
 0x199   : > { %1957 = dma.vmem_to_hbm [thread:$0]  (%p2193_p5), %s2546_s11, 128, %s2544_s20, %s1335_s24  }
 0x19a PF: > { %p1967_p7 = scmp.ge.s32.totalorder %s2129_s15, 2  ;;  %s1376_s7 = sand.u32 1, %s2117_s12  }
 0x19b   : > { %s1377_s8 = scalar_lea.sflag [#allocation3], %s1376_s7 }
 0x19c   : > { %p1961_p8 = pnand %p1967_p7, %p2197_p6 }
 0x19e   : > { %2108 = dma.done.wait (!%p1961_p8), %s1377_s8, 4096  }
 0x19f   : > { %2110 = vsyncadd (!%p1961_p8), %s1377_s8, 4294963200  ;;  %s1386_s9 = scalar_lea.sflag [#allocation5], %s1376_s7 }
 0x1a0   : > { %2112 = dma.done.wait (!%p1961_p8), %s1386_s9, 128  }
 0x1a1   : > { %2114 = vsyncadd (!%p1961_p8), %s1386_s9, 4294967168  ;;  %p17_p5 = scmp.ge.s32.totalorder %s2180_s18, 4   ;;  %s2593_s12 = smov %s2121_s13 }
 0x1a2   : > { %s2594_s13 = smov %s2125_s14  ;;  %s2595_s14 = smov %s2191_s21 }
 0x1a3   : > { %s2596_s15 = smov %s2180_s18  ;;  %19 = sbr.rel (!%p17_p5) target bundleno = 5 (0x5), region = 80 }
 0x1aa   :  { %1391 = vsyncpa [#allocation3], 1 }
 0x1ab   :  { %1393 = vsyncpa [#allocation3 + $0x1], 1 }
 0x1ac   :  { %1394 = vsyncpa [#allocation5], 1 }
 0x1ad   :  { %1396 = vsyncpa [#allocation5 + $0x1], 1 }

</bundles_post_ra>
